<compile_context>
chip_gen: v7x
topology: tpu7x:2x2x1
jax: 0.10.0
libtpu: 0.0.40
codegen_flags: <defaults>
</compile_context>

<pallas_src>
import jax
import jax.numpy as jnp
from jax.experimental import pallas as pl
from jax.experimental.pallas import tpu as pltpu


def _ffn_kernel(x_ref, w1_ref, b1_ref, w2_ref, b2_ref, o_ref):
    # x_ref: (d, tL) compute dtype   w1_ref/w2_ref: (d, d) compute dtype
    # b1_ref/b2_ref: (d, 1) f32      o_ref: (d, tL) output dtype
    x = x_ref[...]
    # conv1 (1x1): contract over input channels; f32 accumulation on the MXU.
    h = jnp.dot(w1_ref[...], x, preferred_element_type=jnp.float32) + b1_ref[...]
    # ReLU, then cast back to compute dtype so the second matmul runs at full
    # MXU rate and the f32 intermediate doesn't linger in VMEM.
    h = jnp.maximum(h, 0.0).astype(x.dtype)
    # conv2 (1x1)
    y = jnp.dot(w2_ref[...], h, preferred_element_type=jnp.float32) + b2_ref[...]
    o_ref[...] = y.astype(o_ref.dtype)


def _round_up(x, m):
    return (x + m - 1) // m * m


def _vmem_budget_bytes():
    """Scoped-VMEM budget with headroom: ~48 MiB on v7x (64 MiB physical),
    ~96-100 MiB on v5e/v6e (128 MiB).  Conservative fallback if the query
    is unavailable."""
    try:
        cap = int(pltpu.get_tpu_info().vmem_capacity_bytes)
    except Exception:
        cap = 64 * 1024 * 1024  # assume the tightest generation (v7x)
    return min((cap * 3) // 4, 100 * 1024 * 1024)


def _choose_position_tile(d, cdt_bytes, out_bytes, vmem_limit, max_tl):
    """Largest lane-dense (multiple-of-128) position tile that fits the VMEM
    budget next to the single-buffered weights and the f32 intermediate."""
    d_sub = _round_up(max(d, 8), 8)        # sublane-padded channel extent
    d_lane = _round_up(max(d, 128), 128)   # lane-padded channel extent
    # W1 + W2 (single-buffered) + lane-padded biases, all VMEM-resident.
    weight_bytes = 2 * d_sub * d_lane * cdt_bytes + 2 * d_sub * 128 * 4
    avail = vmem_limit - weight_bytes - (2 << 20)   # 2 MiB slack
    # Per position-column: x (2 bufs) + out (2 bufs) + f32 h + cast-h scratch.
    per_col = d_sub * (2 * cdt_bytes + 2 * out_bytes + 4 + cdt_bytes)
    tl_fit = max(avail // per_col, 128)
    tl = min(max_tl, tl_fit)
    return max((tl // 128) * 128, 128)


def position_wise_ffn(x, w1, b1, w2, b2, *, compute_dtype=None, max_tl=1024):
    """x: (N, d, L). w1/w2: (d, d) (PyTorch Conv1d weight squeezed), b1/b2: (d,).

    compute_dtype: dtype fed to the MXU.  Defaults to bf16 when x is f32;
    accumulation and bias add stay in f32; output dtype matches x.
    Returns (N, d, L)."""
    N, d, L = x.shape
    out_dtype = x.dtype
    if compute_dtype is None:
        compute_dtype = jnp.bfloat16 if out_dtype == jnp.float32 else out_dtype
    cdt = jnp.dtype(compute_dtype)
    cbytes = cdt.itemsize
    obytes = jnp.dtype(out_dtype).itemsize

    vmem_limit = _vmem_budget_bytes()
    tl = _choose_position_tile(d, cbytes, obytes, vmem_limit, max_tl)

    # No wrapper-side padding or output slicing (saves two full HBM passes):
    # either a single full-extent block (L <= tl, always a legal block shape)
    # or lane-dense tiles of 128*k with a Pallas-masked ragged tail.
    if L <= tl:
        tl = L
    grid = (N, pl.cdiv(L, tl))
    L_work = grid[1] * tl

    x_c = x.astype(cdt)
    w1_c = w1.astype(cdt)
    w2_c = w2.astype(cdt)
    b1_c = b1.astype(jnp.float32).reshape(d, 1)
    b2_c = b2.astype(jnp.float32).reshape(d, 1)

    cost = pl.CostEstimate(
        flops=4 * N * L_work * d * d,
        transcendentals=0,
        bytes_accessed=(N * d * L * cbytes            # x in
                        + N * d * L * obytes          # y out
                        + 2 * d * d * cbytes          # W1, W2
                        + 2 * d * 4),                 # b1, b2
    )

    # Constant-index weights/biases: single-buffer them (double-buffering a
    # resident operand only duplicates it in VMEM).
    resident = pl.Buffered(1)
    # TODO(synk): when 2*d*d*cbytes exceeds the VMEM budget (d >~ 2048 bf16 on
    # v7x), add a channel-reduction grid axis with an f32 accumulator so
    # W1/W2 stream as (d, tk)/(tk, d) tiles instead of being fully resident.

    out = pl.pallas_call(
        _ffn_kernel,
        out_shape=jax.ShapeDtypeStruct((N, d, L), out_dtype),
        grid_spec=pltpu.PrefetchScalarGridSpec(
            num_scalar_prefetch=0,
            grid=grid,
            in_specs=[
                pl.BlockSpec((None, d, tl), lambda n, l: (n, 0, l)),  # x tile
                pl.BlockSpec((d, d), lambda n, l: (0, 0), pipeline_mode=resident),  # W1
                pl.BlockSpec((d, 1), lambda n, l: (0, 0), pipeline_mode=resident),  # b1
                pl.BlockSpec((d, d), lambda n, l: (0, 0), pipeline_mode=resident),  # W2
                pl.BlockSpec((d, 1), lambda n, l: (0, 0), pipeline_mode=resident),  # b2
            ],
            out_specs=pl.BlockSpec((None, d, tl), lambda n, l: (n, 0, l)),
        ),
        compiler_params=pltpu.CompilerParams(
            dimension_semantics=("parallel", "parallel"),
            vmem_limit_bytes=int(vmem_limit),
        ),
        cost_estimate=cost,
    )(x_c, w1_c, b1_c, w2_c, b2_c)

    return out


def _reference(x, w1, b1, w2, b2):
    # Pure-JAX reference mirroring PyTorch Conv1d(k=1) semantics (f32).
    h = jnp.einsum("oc,ncl->nol", w1, x) + b1[None, :, None]
    h = jnp.maximum(h, 0.0)
    y = jnp.einsum("oc,ncl->nol", w2, h) + b2[None, :, None]
    return y


def _make_params(key, N, d, L):
    k_x, k_w1, k_b1, k_w2, k_b2 = jax.random.split(key, 5)
    x = jax.random.normal(k_x, (N, d, L), dtype=jnp.float32)
    w1 = jax.random.normal(k_w1, (d, d), dtype=jnp.float32) * 0.1
    b1 = jax.random.normal(k_b1, (d,), dtype=jnp.float32) * 0.1
    w2 = jax.random.normal(k_w2, (d, d), dtype=jnp.float32) * 0.1
    b2 = jax.random.normal(k_b2, (d,), dtype=jnp.float32) * 0.1
    return x, w1, b1, w2, b2


if __name__ == "__main__":
    key = jax.random.PRNGKey(0)
    k1, k2, k3 = jax.random.split(key, 3)

    # Case 1: tiny shapes consistent with the module (full-L block, exact f32).
    x, w1, b1, w2, b2 = _make_params(k1, N=2, d=8, L=16)
    y = jax.block_until_ready(
        position_wise_ffn(x, w1, b1, w2, b2, compute_dtype=jnp.float32))
    y_ref = _reference(x, w1, b1, w2, b2)
    assert y.shape == x.shape
    assert jnp.allclose(y, y_ref, atol=1e-5, rtol=1e-5), "case1 mismatch"

    # Case 2: lane-aligned d, multi-tile L grid, exact f32 compute.
    x, w1, b1, w2, b2 = _make_params(k2, N=2, d=128, L=384)
    y = jax.block_until_ready(
        position_wise_ffn(x, w1, b1, w2, b2, compute_dtype=jnp.float32, max_tl=128))
    y_ref = _reference(x, w1, b1, w2, b2)
    assert y.shape == x.shape
    assert jnp.allclose(y, y_ref, atol=1e-4, rtol=1e-4), "case2 mismatch"

    # Case 3: ragged L (Pallas-masked tail, no wrapper pad/slice) with the
    # default bf16 MXU feed + f32 accumulation.
    x, w1, b1, w2, b2 = _make_params(k3, N=2, d=128, L=200)
    y = jax.block_until_ready(position_wise_ffn(x, w1, b1, w2, b2, max_tl=128))
    y_ref = _reference(x, w1, b1, w2, b2)
    assert y.shape == x.shape
    assert jnp.allclose(y, y_ref, atol=5e-2, rtol=5e-2), "case3 (bf16 default) mismatch"

    print("KERNEL_OK")
</pallas_src>

<mosaic_0001>
module attributes {stable_mosaic.version = 11 : i64} {
  func.func @_ffn_kernel(%arg0: i32, %arg1: i32, %arg2: memref<1x8x16xf32, #tpu.memory_space<vmem>>, %arg3: memref<8x8xf32, #tpu.memory_space<vmem>>, %arg4: memref<8x1xf32, #tpu.memory_space<vmem>>, %arg5: memref<8x8xf32, #tpu.memory_space<vmem>>, %arg6: memref<8x1xf32, #tpu.memory_space<vmem>>, %arg7: memref<1x8x16xf32, #tpu.memory_space<vmem>>) attributes {dimension_semantics = [#tpu.dimension_semantics<parallel>, #tpu.dimension_semantics<parallel>], iteration_bounds = array<i64: 2, 1>, scalar_prefetch = 0 : i64, scratch_operands = 0 : i64, tpu.core_type = #tpu.core_type<tc>, window_params = [{transform_indices = @transform_0, window_bounds = array<i64: 1, 8, 16>}, {pipeline_mode = #tpu.pipeline_mode<synchronous>, transform_indices = @transform_1, window_bounds = array<i64: 8, 8>}, {pipeline_mode = #tpu.pipeline_mode<synchronous>, transform_indices = @transform_2, window_bounds = array<i64: 8, 1>}, {pipeline_mode = #tpu.pipeline_mode<synchronous>, transform_indices = @transform_3, window_bounds = array<i64: 8, 8>}, {pipeline_mode = #tpu.pipeline_mode<synchronous>, transform_indices = @transform_4, window_bounds = array<i64: 8, 1>}, {transform_indices = @transform_5, window_bounds = array<i64: 1, 8, 16>}]} {
    %c0 = arith.constant 0 : index
    %c0_0 = arith.constant 0 : index
    %c0_1 = arith.constant 0 : index
    %0 = vector.load %arg2[%c0, %c0_0, %c0_1] : memref<1x8x16xf32, #tpu.memory_space<vmem>>, vector<1x8x16xf32>
    %1 = vector.shape_cast %0 : vector<1x8x16xf32> to vector<8x16xf32>
    %c0_2 = arith.constant 0 : index
    %c0_3 = arith.constant 0 : index
    %2 = vector.load %arg3[%c0_2, %c0_3] : memref<8x8xf32, #tpu.memory_space<vmem>>, vector<8x8xf32>
    %cst = arith.constant dense<0.000000e+00> : vector<8x16xf32>
    %3 = tpu.matmul %2, %1, %cst {dimension_numbers = #tpu.dot_dimension_numbers<[1], [0], [0], [1], [0, 0, 1, 1], [], []>} : vector<8x8xf32>, vector<8x16xf32>, vector<8x16xf32> -> vector<8x16xf32>
    %c0_4 = arith.constant 0 : index
    %c0_5 = arith.constant 0 : index
    %4 = vector.load %arg4[%c0_4, %c0_5] : memref<8x1xf32, #tpu.memory_space<vmem>>, vector<8x1xf32>
    %5 = vector.broadcast %4 : vector<8x1xf32> to vector<8x16xf32>
    %6 = arith.addf %3, %5 : vector<8x16xf32>
    %cst_6 = arith.constant 0.000000e+00 : f32
    %7 = vector.broadcast %cst_6 : f32 to vector<8x16xf32>
    %8 = arith.maximumf %6, %7 : vector<8x16xf32>
    %c0_7 = arith.constant 0 : index
    %c0_8 = arith.constant 0 : index
    %9 = vector.load %arg5[%c0_7, %c0_8] : memref<8x8xf32, #tpu.memory_space<vmem>>, vector<8x8xf32>
    %cst_9 = arith.constant dense<0.000000e+00> : vector<8x16xf32>
    %10 = tpu.matmul %9, %8, %cst_9 {dimension_numbers = #tpu.dot_dimension_numbers<[1], [0], [0], [1], [0, 0, 1, 1], [], []>} : vector<8x8xf32>, vector<8x16xf32>, vector<8x16xf32> -> vector<8x16xf32>
    %c0_10 = arith.constant 0 : index
    %c0_11 = arith.constant 0 : index
    %11 = vector.load %arg6[%c0_10, %c0_11] : memref<8x1xf32, #tpu.memory_space<vmem>>, vector<8x1xf32>
    %12 = vector.broadcast %11 : vector<8x1xf32> to vector<8x16xf32>
    %13 = arith.addf %10, %12 : vector<8x16xf32>
    %c0_12 = arith.constant 0 : index
    %c0_13 = arith.constant 0 : index
    %c0_14 = arith.constant 0 : index
    %14 = vector.load %arg7[%c0_12, %c0_13, %c0_14] : memref<1x8x16xf32, #tpu.memory_space<vmem>>, vector<1x8x16xf32>
    %15 = vector.shape_cast %14 : vector<1x8x16xf32> to vector<8x16xf32>
    %16 = vector.shape_cast %13 : vector<8x16xf32> to vector<1x8x16xf32>
    tpu.vector_store %arg7[%c0_12, %c0_13, %c0_14], %16 {strides = array<i32>} : memref<1x8x16xf32, #tpu.memory_space<vmem>>, vector<1x8x16xf32>,
    return
  }
  func.func @transform_0(%arg0: i32, %arg1: i32) -> (i32, i32, i32) {
    %c0_i32 = arith.constant 0 : i32
    %c0_i32_0 = arith.constant 0 : i32
    return %arg0, %c0_i32, %arg1 : i32, i32, i32
  }
  func.func @transform_1(%arg0: i32, %arg1: i32) -> (i32, i32) {
    %c0_i32 = arith.constant 0 : i32
    %c0_i32_0 = arith.constant 0 : i32
    %c0_i32_1 = arith.constant 0 : i32
    return %c0_i32, %c0_i32_0 : i32, i32
  }
  func.func @transform_2(%arg0: i32, %arg1: i32) -> (i32, i32) {
    %c0_i32 = arith.constant 0 : i32
    %c0_i32_0 = arith.constant 0 : i32
    %c0_i32_1 = arith.constant 0 : i32
    return %c0_i32, %c0_i32_0 : i32, i32
  }
  func.func @transform_3(%arg0: i32, %arg1: i32) -> (i32, i32) {
    %c0_i32 = arith.constant 0 : i32
    %c0_i32_0 = arith.constant 0 : i32
    %c0_i32_1 = arith.constant 0 : i32
    return %c0_i32, %c0_i32_0 : i32, i32
  }
  func.func @transform_4(%arg0: i32, %arg1: i32) -> (i32, i32) {
    %c0_i32 = arith.constant 0 : i32
    %c0_i32_0 = arith.constant 0 : i32
    %c0_i32_1 = arith.constant 0 : i32
    return %c0_i32, %c0_i32_0 : i32, i32
  }
  func.func @transform_5(%arg0: i32, %arg1: i32) -> (i32, i32, i32) {
    %c0_i32 = arith.constant 0 : i32
    %c0_i32_0 = arith.constant 0 : i32
    return %arg0, %c0_i32, %arg1 : i32, i32, i32
  }
}

</mosaic_0001>

<bundles_post_ra>
// kernel: tpu_custom_call.1
= control target key start
LH: loop header
LB: loop body
LE: loop exit
PB: predicated region body
PF: predicated region fallthrough
CT: control target
= control target key end

     0   :  { %10 = vsyncpa [#allocation3], 0  ;;  %s928_s0 = inlined_call_operand.vmem [shape: f32[2,8,16], index: 0, kind: input, shape index: {}]   ;;  %s929_s1 = inlined_call_operand.hbm [shape: f32[8,8], index: 1, kind: input, shape index: {}]   ;;  %s930_s2 = inlined_call_operand.vmem [shape: f32[8,1], index: 2, kind: input, shape index: {}]   ;;  %s931_s3 = inlined_call_operand.vmem [shape: f32[8,8], index: 3, kind: input, shape index: {}]   ;;  %s932_s4 = inlined_call_operand.vmem [shape: f32[8,1], index: 4, kind: input, shape index: {}]   ;;  %s933_s5 = inlined_call_operand.hbm [shape: f32[2,8,16], index: 5, kind: output, shape index: {}]  }
   0x1   :  { %11 = vsyncpa [#allocation4], 0 }
   0x2   :  { %13 = vsyncpa [#allocation4 + $0x1], 0  ;;  %s767_s18 = smov 0   ;;  %s769_s19 = smov 0  }
   0x3   :  { %s771_s20 = smov 0   ;;  %s773_s21 = smov 0  }
   0x4   :  { %s775_s22 = smov 0   ;;  %s777_s23 = smov 0  }
   0x5 LB: > { %s521_s24 = sadd.s32 4294967295, %s730_s23   ;;  %s522_s25 = sadd.s32 4294967294, %s730_s23   ;;  %s730_s23 = sphi %s777_s23, %s19_s23   ;;  %s726_s22 = sphi %s775_s22, %s951_s22   ;;  %s722_s21 = sphi %s773_s21, %s950_s21   ;;  %s718_s20 = sphi %s771_s20, %s949_s20   ;;  %s714_s19 = sphi %s769_s19, %s948_s19   ;;  %s710_s18 = sphi %s767_s18, %s947_s18  }
   0x6   : > { %s31_s26 = sadd.s32 1, %s726_s22  ;;  %s152_s27 = sadd.s32 1, %s718_s20 }
   0x7   : > { %p33_p0 = scmp.ge.s32.totalorder %s31_s26, 2  ;;  %p162_p1 = scmp.ne.s32.totalorder %s718_s20, %s714_s19 }
   0x8   : > { %p163_p2 = scmp.eq.s32.totalorder %s521_s24, 1  ;;  %p168_p3 = scmp.ne.s32.totalorder %s714_s19, %s710_s18 }
   0x9   : > { %s953_s26 = smov (%p33_p0, %s31_s26), 0  ;;  %p169_p5 = scmp.eq.s32.totalorder %s522_s25, 1 }
   0xa   : > { %p807_p4 = por %p163_p2, %p162_p1  ;;  %s147_s29 = ssub.s32 %s726_s22, %s953_s26 }
   0xb   : > { %p523_p6 = scmp.ge.s32.totalorder %s730_s23, 1  ;;  %p150_p7 = scmp.eq.s32.totalorder %s147_s29, 0 }
   0xc   : > { %s938_s28 = scalar_select %p807_p4, 1, 0 }
   0xd   : > { %p814_p8 = por %p169_p5, %p168_p3  ;;  %p176_p9 = scmp.lt.s32.totalorder %s730_s23, 3 }
   0xe   : > { %s820_s6 = scalar_select %p150_p7, %s718_s20, %s152_s27  }
   0xf   : > { %s939_s30 = scalar_select %p814_p8, 1, 0 }
  0x10   : > { %p822_p10 = pnand %p523_p6, %p176_p9  ;;  %p826_p11 = scmp.eq.s32.totalorder %s521_s24, 0 }
  0x11   : > { %s732_s9 = smov [#allocation2]   ;;  %s620_s14 = scalar_lea.hbm %s929_s1, 128 }
  0x12   : > { %s940_s7 = scalar_select %p822_p10, 1, 0 }
  0x13   : > { %s941_s8 = scalar_select %p826_p11, 1, 0 }
  0x14   : > { %p556_p12 = pneg %p822_p10  ;;  %s189_s10 = sshll.u32 %s732_s9, 4  ;;  %s190_s10 = int_to_ptr.vmem [resolvable:$true] %s189_s10 }
  0x15   : > { %p621_p0 = scmp.ne.s32.totalorder %s929_s1, %s620_s14  ;;  %p627_p5 = scmp.lt.u32.totalorder %s620_s14, %s929_s1 }
  0x16   : > { %p834_p13 = pnand %p826_p11, %p556_p12 }
  0x18   : > { %p622_p1 = pneg %p834_p13 }
  0x1a   : > { %p623_p2 = pnand %p622_p1, %p621_p0 }
  0x1c   : > { %p624_p3 = pneg %p623_p2 }
  0x1e   : > { %p629_p6 = pnand %p627_p5, %p624_p3 }
  0x20   : > { %632 = shalt.err (!%p629_p6)
}
  0x21   : > { %s633_s25 = scalar_lea.vmem %s190_s10, 128  ;;  %p641_p8 = scmp.lt.s32.totalorder %s190_s10, %s190_s10 }
  0x22   : > { %p634_p7 = scmp.ne.s32.totalorder %s190_s10, %s633_s25  ;;  %p642_p4 = scmp.lt.s32.totalorder %s633_s25, %s633_s25 }
  0x24   : > { %p636_p9 = pnand %p634_p7, %p622_p1  ;;  %p643_p11 = por %p642_p4, %p641_p8 }
  0x26   : > { %p637_p12 = pneg %p636_p9 }
  0x28   : > { %p644_p10 = pnand %p643_p11, %p637_p12 }
  0x2a   : > { %647 = shalt.err (!%p644_p10)
}
  0x2b   : > { %559 = dma.hbm_to_vmem [thread:$0]  (!%p834_p13), %s929_s1, 128, %s190_s10, [#allocation3]  }
  0x2c   : > { %p943_p0 = scmp.ne.s32.totalorder %s940_s7, 0 }
  0x2d   : > { %p944_p2 = scmp.ne.s32.totalorder (!%p943_p0), %s941_s8, 0 }
  0x2e   : > { %221 = sbr.rel (%p943_p0) target bundleno = 507 (0x1fb), region = 40 }
  0x35   : > { %701 = dma.done.wait (%p944_p2), [#allocation3], 128  }
  0x36   : > { %703 = vsyncadd (%p944_p2), [#allocation3], 4294967168  ;;  %p251_p4 = scmp.lt.s32.totalorder %s722_s21, 1  ;;  %v733_v0 = vmov 0.0   ;;  %vm734_vm0 = vmmov 0   ;;  %v735_v1 = vmov 0  }
  0x37   : > { %540 = vmatprep.subr.mxu0 %v733_v0  ;;  %542 = vmatprep.mubr.msk.f32.mxu0 %vm734_vm0, %v733_v0  ;;  %vm266_vm1 = vcmask 64512   ;;  %v259_v3 = vld [vmem:[#allocation2] sm:$0xff]  ;;  %s248_s24 = sand.u32 1, %s714_s19   ;;  %s533_s27 = sshll.u32 %s722_s21, 7  ;;  %vm421_vm2 = vcmask 130048  }
  0x38   : > { %s252_s9 = scalar_select %p251_p4, %s722_s21, 1  ;;  %619 = vset.pattern.permute.xlu0 %v735_v1  ;;  %545 = vmatprep.subr.mxu1 %v733_v0  ;;  %v260_v4 = vld [vmem:[%s930_s2] sm:$0xff] }
  0x39   : > { %547 = vmatprep.mubr.msk.f32.mxu1 %vm734_vm0, %v733_v0  ;;  %263 = vperm.xlu0 %619, %v260_v4   ;;  %v342_v5 = vld [vmem:[%s932_s4] sm:$0xff]  ;;  %s528_s25 = sshll.u32 %s248_s24, 3  ;;  %s881_s11 = scalar_lea.hbm %s933_s5, %s533_s27 }
  0x3a   : > { %s529_s7 = sshll.u32 %s252_s9, 3  ;;  %v341_v11 = vld [vmem:[%s931_s3] sm:$0xff]  ;;  %s250_s29 = scalar_lea.vmem [#allocation5], %s528_s25 }
  0x3b   : > { %s257_s12 = scalar_lea.vmem %s928_s0, %s529_s7  ;;  %s438_s9 = sshll.u32 %s250_s29, 4  ;;  %s883_s9 = int_to_ptr.vmem [resolvable:$true] %s438_s9 }
  0x3c   : > { %v258_v2 = vld [vmem:[%s257_s12] sm:$0xff]  ;;  %s424_s12 = scalar_lea.sflag [#allocation4], %s248_s24  ;;  %s648_s21 = scalar_lea.vmem %s883_s9, 128 }
  0x3d   : > { %541 = vmatpush3.msra.mxu0 %v258_v2  ;;  %345 = vperm.xlu0 %619, %v342_v5   ;;  %p649_p8 = scmp.ne.s32.totalorder %s883_s9, %s648_s21  ;;  %p945_p10 = scmp.ne.s32.totalorder %s938_s28, 0 }
  0x3e   : > { %543 = vmatmul.mubr.msk.f32.vlgmr.msra.gmra.mrb[0].mxu0 %vm266_vm1, %v259_v3  ;;  %s736_s8 = smov [#allocation5]  }
  0x3f   : > { %p650_p11 = pnand %p649_p8, %p945_p10  ;;  %s652_s13 = sshll.u32 %s736_s8, 4  ;;  %s653_s13 = int_to_ptr.vmem [resolvable:$false] %s652_s13 }
  0x40   : > { %s654_s14 = scalar_lea.vmem %s653_s13, 256  ;;  %p655_p1 = scmp.lt.s32.totalorder %s883_s9, %s653_s13 }
  0x41   : > { %p651_p13 = pneg %p650_p11  ;;  %p656_p3 = scmp.lt.s32.totalorder %s654_s14, %s648_s21 }
  0x43   : > { %p657_p5 = por %p656_p3, %p655_p1 }
  0x45   : > { %p658_p6 = pnand %p657_p5, %p651_p13 }
  0xb8   : > { %v264_v6 = vpop.permute.xlu0 %263 }
  0xbc   : > { %v346_v12 = vpop.permute.xlu0 %345 }
 0x111   : > { %v336_v7 = vpop.f32.mrb[0].mxu0 }
 0x112   : > { %v337_v8 = vadd.f32 %v336_v7, %v264_v6  ;;  %v544_v9 = vpop.f32.mrb[1].mxu0 }
 0x114   : > { %v340_v10 = vmax.f32 %v337_v8, 0.0 }
 0x116   : > { %546 = vmatpush3.msra.mxu1 %v340_v10 }
 0x117   : > { %548 = vmatmul.mubr.msk.f32.vlgmr.msra.gmra.mrb[0].mxu1 %vm266_vm1, %v341_v11 }
 0x1ea   : > { %v417_v13 = vpop.f32.mrb[0].mxu1 }
 0x1eb   : > { %v418_v14 = vadd.f32 %v417_v13, %v346_v12  ;;  %v549_v15 = vpop.f32.mrb[1].mxu1 }
 0x1ed   : > { %422 = vst.msk [vmem:[%s250_s29] sm:$0xff] %vm421_vm2, %v418_v14 }
 0x1ee   : > { %661 = shalt.err (!%p658_p6)
}
 0x1ef   : > { %s662_s15 = scalar_lea.hbm %s881_s11, 128  ;;  %s666_s24 = scalar_lea.hbm %s933_s5, 256 }
 0x1f0   : > { %p663_p7 = scmp.ne.s32.totalorder %s881_s11, %s662_s15  ;;  %p667_p0 = scmp.lt.u32.totalorder %s881_s11, %s933_s5 }
 0x1f1   : > { %p668_p2 = scmp.lt.u32.totalorder %s666_s24, %s662_s15  ;;  %p670_p8 = scmp.lt.u32.totalorder %s662_s15, %s881_s11 }
 0x1f2   : > { %p664_p9 = pnand %p663_p7, %p945_p10 }
 0x1f3   : > { %p669_p4 = por %p668_p2, %p667_p0 }
 0x1f4   : > { %p665_p12 = pneg %p664_p9 }
 0x1f5   : > { %p671_p11 = por %p670_p8, %p669_p4 }
 0x1f7   : > { %p672_p13 = pnand %p671_p11, %p665_p12 }
 0x1f9   : > { %675 = shalt.err (!%p672_p13)
}
 0x1fa   : > { %554 = dma.vmem_to_hbm [thread:$0]  (%p945_p10), %s883_s9, 128, %s881_s11, %s424_s12  }
 0x1fb PF: > { %p566_p1 = scmp.ge.s32.totalorder %s730_s23, 2  ;;  %s450_s29 = sand.u32 1, %s710_s18  }
 0x1fc   : > { %p946_p3 = scmp.ne.s32.totalorder %s939_s30, 0  ;;  %s451_s7 = scalar_lea.sflag [#allocation4], %s450_s29 }
 0x1fe   : > { %p561_p5 = pnand %p566_p1, %p946_p3 }
 0x200   : > { %705 = dma.done.wait (!%p561_p5), %s451_s7, 128  }
 0x201   : > { %707 = vsyncadd (!%p561_p5), %s451_s7, 4294967168  ;;  %s19_s23 = sadd.s32 1, %s730_s23   ;;  %s947_s18 = smov %s714_s19 }
 0x202   : > { %p16_p6 = scmp.ge.s32.totalorder %s19_s23, 4   ;;  %s948_s19 = smov %s718_s20 }
 0x203   : > { %s949_s20 = smov %s820_s6  ;;  %s950_s21 = smov %s726_s22 }
 0x204   : > { %s951_s22 = smov %s953_s26  ;;  %18 = sbr.rel (!%p16_p6) target bundleno = 5 (0x5), region = 80 }
 0x20b   :  { %456 = vsyncpa [#allocation3], 1 }
 0x20c   :  { %458 = vsyncpa [#allocation3 + $0x1], 1 }
 0x20d   :  { %459 = vsyncpa [#allocation4], 1 }
 0x20e   :  { %461 = vsyncpa [#allocation4 + $0x1], 1 }

</bundles_post_ra>
